<compile_context>
chip_gen: v5e
topology: v5e:2x2
jax: 0.10.0
libtpu: 0.0.40
codegen_flags: <defaults>
</compile_context>

<pallas_src>
import functools

import jax
import jax.numpy as jnp
from jax.experimental import pallas as pl
from jax.experimental.pallas import tpu as pltpu

EPSILON = 1e-6  # the undefined global `epsilon` in the PyTorch source

_MAX_C_UNROLL = 16  # bound on the static per-channel dot unroll inside the kernel


def _selection_kernel(qz_ref, eps_ref, x_ref, o_ref, *, inv_temperature, c_blk):
    # qz_ref : (N, M)                   shared parameter (constant index_map -> fetched once)
    # eps_ref: (1, N, M)                per-batch uniform noise (re-fetched only when b changes)
    # x_ref  : (1, c_blk, N, t_chunk)   native-layout input block
    # o_ref  : (1, c_blk, M, t_chunk)   native-layout output block

    # Gumbel-softmax selection weights.  Recomputed every grid step: it is a
    # handful of VPU/EUP/XLU ops on a single (N, M) tile, entirely hidden under
    # the DMA-bound pipeline, and avoiding a carried scratch keeps all grid
    # axes 'parallel' (v7x dual-TensorCore sharding).
    g = -jnp.log(-jnp.log(eps_ref[0]))                 # (N, M) Gumbel noise
    y = (qz_ref[...] + g) * inv_temperature
    y = y - jnp.max(y, axis=0, keepdims=True)          # softmax over N (torch dim=1)
    e = jnp.exp(y)
    z = e / jnp.sum(e, axis=0, keepdims=True)          # exact divide (runs once per step, cheap)
    z = z.astype(x_ref.dtype)

    # out[c, m, t] = sum_n z[n, m] * x[c, n, t]: one MXU dot per conv channel,
    # written straight into the (B, C, M, T) layout.  z^T is never materialized;
    # the contraction pairs dim 0 of z with dim 0 of x[c].
    for c in range(c_blk):                             # short static unroll (<= _MAX_C_UNROLL)
        o_ref[0, c] = jax.lax.dot_general(
            z, x_ref[0, c],
            dimension_numbers=(((0,), (0,)), ((), ())),
            preferred_element_type=jnp.float32,
        ).astype(o_ref.dtype)


def _vmem_limits():
    """(vmem_limit_bytes, block_budget_bytes) derived from the chip's VMEM capacity."""
    try:
        cap = int(pltpu.get_tpu_info().vmem_capacity_bytes)
    except Exception:
        cap = 64 << 20  # conservative fallback (v7x-sized VMEM)
    vmem_limit = min(int(cap * 0.75), 100 << 20)   # ~48 MiB on v7x, ~96 MiB on v5e/v6e
    block_budget = int(vmem_limit * 0.85)          # headroom for eps/qz blocks + Mosaic scratch
    return vmem_limit, block_budget


def _choose_blocks(C, N, M, T, itemsize, budget_bytes):
    """Pick (c_blk, t_chunk) so double-buffered x/out blocks fit the VMEM budget.

    Preference order for this mem-bound stream: keep T whole (longest contiguous
    DMA rows), then shrink the C block, then chunk T in 128-lane multiples.
    Partial trailing blocks are handled by pl.cdiv grids: the contraction is
    over N, so padded C rows / T lanes only produce garbage in masked-out
    regions of the output block.
    """
    def step_bytes(c_blk, t_chunk):
        # 2x for double buffering of both the x block and the out block.
        return 2 * c_blk * (N + M) * t_chunk * itemsize

    c_blk = min(C, _MAX_C_UNROLL)
    t_chunk = T
    while c_blk > 1 and step_bytes(c_blk, t_chunk) > budget_bytes:
        c_blk = (c_blk + 1) // 2
    if step_bytes(c_blk, t_chunk) > budget_bytes:
        max_t = budget_bytes // (2 * c_blk * (N + M) * itemsize)
        t_chunk = min(T, max(128, (max_t // 128) * 128))
    return c_blk, t_chunk


def selection_layer_forward(x, qz_loga, eps, temperature=1.0):
    """x: (B, C, N, T); qz_loga: (N, M); eps: (B, N, M).  Returns (B, C, M, T)."""
    B, C, N, T = x.shape
    N2, M = qz_loga.shape
    assert N2 == N and eps.shape == (B, N, M)

    vmem_limit, block_budget = _vmem_limits()
    itemsize = jnp.dtype(x.dtype).itemsize
    c_blk, t_chunk = _choose_blocks(C, N, M, T, itemsize, block_budget)

    kernel = functools.partial(_selection_kernel,
                               inv_temperature=1.0 / float(temperature),
                               c_blk=c_blk)

    grid = (B, pl.cdiv(C, c_blk), pl.cdiv(T, t_chunk))

    return pl.pallas_call(
        kernel,
        out_shape=jax.ShapeDtypeStruct((B, C, M, T), x.dtype),
        grid_spec=pltpu.PrefetchScalarGridSpec(
            num_scalar_prefetch=0,
            grid=grid,
            in_specs=[
                pl.BlockSpec((N, M), lambda b, ci, ti: (0, 0)),          # qz_loga (shared)
                pl.BlockSpec((1, N, M), lambda b, ci, ti: (b, 0, 0)),    # eps per batch
                pl.BlockSpec((1, c_blk, N, t_chunk),
                             lambda b, ci, ti: (b, ci, 0, ti)),          # x, native layout
            ],
            out_specs=pl.BlockSpec((1, c_blk, M, t_chunk),
                                   lambda b, ci, ti: (b, ci, 0, ti)),    # out, native layout
        ),
        compiler_params=pltpu.CompilerParams(
            # No cross-iteration state -> every axis is parallel (megacore / v7x 2-TC).
            dimension_semantics=("parallel", "parallel", "parallel"),
            vmem_limit_bytes=vmem_limit,
        ),
    )(qz_loga, eps, x)


def selection_layer_reference(x, qz_loga, eps, temperature=1.0):
    """Pure-JAX reference mirroring the PyTorch training forward."""
    g = -jnp.log(-jnp.log(eps))                        # (B, N, M)
    y = (qz_loga[None] + g) / temperature              # (B, N, M)
    z = jax.nn.softmax(y, axis=1)                      # softmax over N
    z_t = jnp.swapaxes(z[:, None], 2, 3)               # (B, 1, M, N)
    return jnp.matmul(z_t, x)                          # (B, C, M, T)


if __name__ == "__main__":
    # Small shapes: batch=2, conv-channels=4, N=16 input channels, M=4 selected,
    # T=64 time steps.
    B, C, N, M, T = 2, 4, 16, 4, 64
    temperature = 1.0

    key = jax.random.PRNGKey(0)
    k_x, k_q, k_e = jax.random.split(key, 3)

    x = jax.random.normal(k_x, (B, C, N, T), dtype=jnp.float32)
    qz_loga = jax.random.normal(k_q, (N, M), dtype=jnp.float32) / 100.0  # torch.randn(N,M)/100
    eps = jax.random.uniform(k_e, (B, N, M), dtype=jnp.float32,
                             minval=EPSILON, maxval=1.0 - EPSILON)

    # TODO(synk): eval-mode path (argmax one-hot sample_z) is plain-JAX territory
    # and is not kernelized; only the training forward is implemented here.
    out = jax.block_until_ready(selection_layer_forward(x, qz_loga, eps, temperature))

    ref = selection_layer_reference(x, qz_loga, eps, temperature)
    assert out.shape == (B, C, M, T)
    assert jnp.allclose(out, ref, atol=1e-5, rtol=1e-5), "mismatch vs reference"

    print("KERNEL_OK")
</pallas_src>

<mosaic_0001>
module attributes {stable_mosaic.version = 11 : i64} {
  func.func @_selection_kernel(%arg0: i32, %arg1: i32, %arg2: i32, %arg3: memref<16x4xf32, #tpu.memory_space<vmem>>, %arg4: memref<1x16x4xf32, #tpu.memory_space<vmem>>, %arg5: memref<1x4x16x64xf32, #tpu.memory_space<vmem>>, %arg6: memref<1x4x4x64xf32, #tpu.memory_space<vmem>>) attributes {dimension_semantics = [#tpu.dimension_semantics<parallel>, #tpu.dimension_semantics<parallel>, #tpu.dimension_semantics<parallel>], iteration_bounds = array<i64: 2, 1, 1>, scalar_prefetch = 0 : i64, scratch_operands = 0 : i64, tpu.core_type = #tpu.core_type<tc>, window_params = [{pipeline_mode = #tpu.pipeline_mode<synchronous>, transform_indices = @transform_0, window_bounds = array<i64: 16, 4>}, {transform_indices = @transform_1, window_bounds = array<i64: 1, 16, 4>}, {transform_indices = @transform_2, window_bounds = array<i64: 1, 4, 16, 64>}, {transform_indices = @transform_3, window_bounds = array<i64: 1, 4, 4, 64>}]} {
    %c0 = arith.constant 0 : index
    %c0_0 = arith.constant 0 : index
    %c0_1 = arith.constant 0 : index
    %0 = vector.load %arg4[%c0, %c0_0, %c0_1] : memref<1x16x4xf32, #tpu.memory_space<vmem>>, vector<1x16x4xf32>
    %1 = vector.shape_cast %0 : vector<1x16x4xf32> to vector<16x4xf32>
    %2 = math.log %1 : vector<16x4xf32>
    %cst = arith.constant 0.000000e+00 : f32
    %3 = vector.broadcast %cst : f32 to vector<16x4xf32>
    %4 = arith.subf %3, %2 : vector<16x4xf32>
    %5 = math.log %4 : vector<16x4xf32>
    %cst_2 = arith.constant 0.000000e+00 : f32
    %6 = vector.broadcast %cst_2 : f32 to vector<16x4xf32>
    %7 = arith.subf %6, %5 : vector<16x4xf32>
    %c0_3 = arith.constant 0 : index
    %c0_4 = arith.constant 0 : index
    %8 = vector.load %arg3[%c0_3, %c0_4] : memref<16x4xf32, #tpu.memory_space<vmem>>, vector<16x4xf32>
    %9 = arith.addf %8, %7 : vector<16x4xf32>
    %cst_5 = arith.constant 1.000000e+00 : f32
    %10 = vector.broadcast %cst_5 : f32 to vector<16x4xf32>
    %11 = arith.mulf %9, %10 : vector<16x4xf32>
    %cst_6 = arith.constant dense<0xFF800000> : vector<4xf32>
    %12 = vector.multi_reduction <maximumf>, %11, %cst_6 [0] : vector<16x4xf32> to vector<4xf32>
    %13 = vector.shape_cast %12 : vector<4xf32> to vector<1x4xf32>
    %14 = vector.broadcast %13 : vector<1x4xf32> to vector<16x4xf32>
    %15 = arith.subf %11, %14 : vector<16x4xf32>
    %16 = math.exp %15 : vector<16x4xf32>
    %cst_7 = arith.constant dense<0.000000e+00> : vector<4xf32>
    %17 = vector.multi_reduction <add>, %16, %cst_7 [0] : vector<16x4xf32> to vector<4xf32>
    %18 = vector.shape_cast %17 : vector<4xf32> to vector<1x4xf32>
    %19 = vector.broadcast %18 : vector<1x4xf32> to vector<16x4xf32>
    %20 = arith.divf %16, %19 : vector<16x4xf32>
    %c0_8 = arith.constant 0 : index
    %c0_9 = arith.constant 0 : index
    %c0_10 = arith.constant 0 : index
    %c0_11 = arith.constant 0 : index
    %21 = vector.load %arg5[%c0_8, %c0_9, %c0_10, %c0_11] : memref<1x4x16x64xf32, #tpu.memory_space<vmem>>, vector<1x1x16x64xf32>
    %22 = vector.shape_cast %21 : vector<1x1x16x64xf32> to vector<16x64xf32>
    %cst_12 = arith.constant dense<0.000000e+00> : vector<4x64xf32>
    %23 = tpu.matmul %20, %22, %cst_12 {dimension_numbers = #tpu.dot_dimension_numbers<[0], [0], [1], [1], [0, 1, 1, 1], [], []>} : vector<16x4xf32>, vector<16x64xf32>, vector<4x64xf32> -> vector<4x64xf32>
    %c0_13 = arith.constant 0 : index
    %c0_14 = arith.constant 0 : index
    %c0_15 = arith.constant 0 : index
    %c0_16 = arith.constant 0 : index
    %24 = vector.load %arg6[%c0_13, %c0_14, %c0_15, %c0_16] : memref<1x4x4x64xf32, #tpu.memory_space<vmem>>, vector<1x1x4x64xf32>
    %25 = vector.shape_cast %24 : vector<1x1x4x64xf32> to vector<4x64xf32>
    %26 = vector.shape_cast %23 : vector<4x64xf32> to vector<1x1x4x64xf32>
    tpu.vector_store %arg6[%c0_13, %c0_14, %c0_15, %c0_16], %26 {strides = array<i32>} : memref<1x4x4x64xf32, #tpu.memory_space<vmem>>, vector<1x1x4x64xf32>,
    %c0_17 = arith.constant 0 : index
    %c1 = arith.constant 1 : index
    %c0_18 = arith.constant 0 : index
    %c0_19 = arith.constant 0 : index
    %27 = vector.load %arg5[%c0_17, %c1, %c0_18, %c0_19] : memref<1x4x16x64xf32, #tpu.memory_space<vmem>>, vector<1x1x16x64xf32>
    %28 = vector.shape_cast %27 : vector<1x1x16x64xf32> to vector<16x64xf32>
    %cst_20 = arith.constant dense<0.000000e+00> : vector<4x64xf32>
    %29 = tpu.matmul %20, %28, %cst_20 {dimension_numbers = #tpu.dot_dimension_numbers<[0], [0], [1], [1], [0, 1, 1, 1], [], []>} : vector<16x4xf32>, vector<16x64xf32>, vector<4x64xf32> -> vector<4x64xf32>
    %c0_21 = arith.constant 0 : index
    %c1_22 = arith.constant 1 : index
    %c0_23 = arith.constant 0 : index
    %c0_24 = arith.constant 0 : index
    %30 = vector.load %arg6[%c0_21, %c1_22, %c0_23, %c0_24] : memref<1x4x4x64xf32, #tpu.memory_space<vmem>>, vector<1x1x4x64xf32>
    %31 = vector.shape_cast %30 : vector<1x1x4x64xf32> to vector<4x64xf32>
    %32 = vector.shape_cast %29 : vector<4x64xf32> to vector<1x1x4x64xf32>
    tpu.vector_store %arg6[%c0_21, %c1_22, %c0_23, %c0_24], %32 {strides = array<i32>} : memref<1x4x4x64xf32, #tpu.memory_space<vmem>>, vector<1x1x4x64xf32>,
    %c0_25 = arith.constant 0 : index
    %c2 = arith.constant 2 : index
    %c0_26 = arith.constant 0 : index
    %c0_27 = arith.constant 0 : index
    %33 = vector.load %arg5[%c0_25, %c2, %c0_26, %c0_27] : memref<1x4x16x64xf32, #tpu.memory_space<vmem>>, vector<1x1x16x64xf32>
    %34 = vector.shape_cast %33 : vector<1x1x16x64xf32> to vector<16x64xf32>
    %cst_28 = arith.constant dense<0.000000e+00> : vector<4x64xf32>
    %35 = tpu.matmul %20, %34, %cst_28 {dimension_numbers = #tpu.dot_dimension_numbers<[0], [0], [1], [1], [0, 1, 1, 1], [], []>} : vector<16x4xf32>, vector<16x64xf32>, vector<4x64xf32> -> vector<4x64xf32>
    %c0_29 = arith.constant 0 : index
    %c2_30 = arith.constant 2 : index
    %c0_31 = arith.constant 0 : index
    %c0_32 = arith.constant 0 : index
    %36 = vector.load %arg6[%c0_29, %c2_30, %c0_31, %c0_32] : memref<1x4x4x64xf32, #tpu.memory_space<vmem>>, vector<1x1x4x64xf32>
    %37 = vector.shape_cast %36 : vector<1x1x4x64xf32> to vector<4x64xf32>
    %38 = vector.shape_cast %35 : vector<4x64xf32> to vector<1x1x4x64xf32>
    tpu.vector_store %arg6[%c0_29, %c2_30, %c0_31, %c0_32], %38 {strides = array<i32>} : memref<1x4x4x64xf32, #tpu.memory_space<vmem>>, vector<1x1x4x64xf32>,
    %c0_33 = arith.constant 0 : index
    %c3 = arith.constant 3 : index
    %c0_34 = arith.constant 0 : index
    %c0_35 = arith.constant 0 : index
    %39 = vector.load %arg5[%c0_33, %c3, %c0_34, %c0_35] : memref<1x4x16x64xf32, #tpu.memory_space<vmem>>, vector<1x1x16x64xf32>
    %40 = vector.shape_cast %39 : vector<1x1x16x64xf32> to vector<16x64xf32>
    %cst_36 = arith.constant dense<0.000000e+00> : vector<4x64xf32>
    %41 = tpu.matmul %20, %40, %cst_36 {dimension_numbers = #tpu.dot_dimension_numbers<[0], [0], [1], [1], [0, 1, 1, 1], [], []>} : vector<16x4xf32>, vector<16x64xf32>, vector<4x64xf32> -> vector<4x64xf32>
    %c0_37 = arith.constant 0 : index
    %c3_38 = arith.constant 3 : index
    %c0_39 = arith.constant 0 : index
    %c0_40 = arith.constant 0 : index
    %42 = vector.load %arg6[%c0_37, %c3_38, %c0_39, %c0_40] : memref<1x4x4x64xf32, #tpu.memory_space<vmem>>, vector<1x1x4x64xf32>
    %43 = vector.shape_cast %42 : vector<1x1x4x64xf32> to vector<4x64xf32>
    %44 = vector.shape_cast %41 : vector<4x64xf32> to vector<1x1x4x64xf32>
    tpu.vector_store %arg6[%c0_37, %c3_38, %c0_39, %c0_40], %44 {strides = array<i32>} : memref<1x4x4x64xf32, #tpu.memory_space<vmem>>, vector<1x1x4x64xf32>,
    return
  }
  func.func @transform_0(%arg0: i32, %arg1: i32, %arg2: i32) -> (i32, i32) {
    %c0_i32 = arith.constant 0 : i32
    %c0_i32_0 = arith.constant 0 : i32
    %c0_i32_1 = arith.constant 0 : i32
    return %c0_i32, %c0_i32_0 : i32, i32
  }
  func.func @transform_1(%arg0: i32, %arg1: i32, %arg2: i32) -> (i32, i32, i32) {
    %c0_i32 = arith.constant 0 : i32
    %c0_i32_0 = arith.constant 0 : i32
    %c0_i32_1 = arith.constant 0 : i32
    return %arg0, %c0_i32, %c0_i32_0 : i32, i32, i32
  }
  func.func @transform_2(%arg0: i32, %arg1: i32, %arg2: i32) -> (i32, i32, i32, i32) {
    %c0_i32 = arith.constant 0 : i32
    %c0_i32_0 = arith.constant 0 : i32
    return %arg0, %arg1, %c0_i32, %arg2 : i32, i32, i32, i32
  }
  func.func @transform_3(%arg0: i32, %arg1: i32, %arg2: i32) -> (i32, i32, i32, i32) {
    %c0_i32 = arith.constant 0 : i32
    %c0_i32_0 = arith.constant 0 : i32
    return %arg0, %arg1, %c0_i32, %arg2 : i32, i32, i32, i32
  }
}

</mosaic_0001>

<bundles_post_ra>
// kernel: tpu_custom_call.1
= control target key start
LH: loop header
LB: loop body
LE: loop exit
PB: predicated region body
PF: predicated region fallthrough
CT: control target
= control target key end

     0   :  { %8 = vsyncpa [#allocation3], 0  ;;  %s959_s0 = inlined_call_operand.vmem [shape: f32[16,4], index: 0, kind: input, shape index: {}]   ;;  %s960_s1 = inlined_call_operand.vmem [shape: f32[2,16,4], index: 1, kind: input, shape index: {}]   ;;  %s961_s2 = inlined_call_operand.hbm [shape: f32[2,4,16,64], index: 2, kind: input, shape index: {}]   ;;  %s962_s3 = inlined_call_operand.hbm [shape: f32[2,4,4,64], index: 3, kind: output, shape index: {}]  }
   0x1   :  { %10 = vsyncpa [#allocation3 + $0x1], 0 }
   0x2   :  { %11 = vsyncpa [#allocation4], 0 }
   0x3   :  { %13 = vsyncpa [#allocation4 + $0x1], 0  ;;  %s813_s12 = smov 0   ;;  %s815_s13 = smov 0  }
   0x4   :  { %s817_s14 = smov 0   ;;  %s819_s15 = smov 0  }
   0x5   :  { %s821_s16 = smov 0   ;;  %s823_s17 = smov 0  }
   0x6 LB: > { %s561_s18 = sadd.s32 4294967295, %s787_s17   ;;  %s562_s19 = sadd.s32 4294967294, %s787_s17   ;;  %s787_s17 = sphi %s823_s17, %s19_s17   ;;  %s783_s16 = sphi %s821_s16, %s971_s16   ;;  %s779_s15 = sphi %s819_s15, %s970_s15   ;;  %s775_s14 = sphi %s817_s14, %s969_s14   ;;  %s771_s13 = sphi %s815_s13, %s968_s13   ;;  %s767_s12 = sphi %s813_s12, %s967_s12  }
   0x7   : > { %s38_s20 = sadd.s32 1, %s783_s16  ;;  %s96_s21 = sadd.s32 1, %s775_s14 }
   0x8   : > { %p40_p0 = scmp.ge.s32.totalorder %s38_s20, 2  ;;  %p103_p1 = scmp.ne.s32.totalorder %s775_s14, %s771_s13 }
   0x9   : > { %p104_p2 = scmp.eq.s32.totalorder %s787_s17, 0  ;;  %p109_p3 = scmp.ne.s32.totalorder %s771_s13, %s767_s12 }
   0xa   : > { %s973_s20 = smov (%p40_p0, %s38_s20), 0  ;;  %p110_p5 = scmp.eq.s32.totalorder %s561_s18, 0 }
   0xb   : > { %p854_p4 = por %p104_p2, %p103_p1  ;;  %s89_s23 = ssub.s32 %s783_s16, %s973_s20 }
   0xc   : > { %p137_p6 = scmp.eq.s32.totalorder %s561_s18, 1  ;;  %p94_p7 = scmp.eq.s32.totalorder %s89_s23, 0 }
   0xd   : > { %p860_p8 = por %p110_p5, %p109_p3  ;;  %p143_p10 = scmp.eq.s32.totalorder %s562_s19, 1 }
   0xe   : > { %p864_p9 = por %p137_p6, %p103_p1  ;;  %p564_p12 = scmp.ge.s32.totalorder %s787_s17, 2 }
   0xf   : > { %s869_s26 = scalar_select %p94_p7, %s775_s14, %s96_s21  }
  0x10   : > { %p871_p11 = por %p143_p10, %p109_p3  ;;  %p606_p13 = scmp.lt.s32.totalorder %s787_s17, 2 }
  0x11   : > { %s174_s28 = sand.u32 1, %s775_s14   ;;  %s591_s30 = sshll.u32 %s783_s16, 6 }
  0x12   : > { %s565_s29 = sshll.u32 %s174_s28, 6  ;;  %s187_s6 = scalar_lea.hbm %s961_s2, %s591_s30 }
  0x13   : > { %s178_s7 = scalar_lea.vmem [#allocation2], %s565_s29  ;;  %s188_s9 = sshll.u32 %s187_s6, 4  ;;  %s189_s9 = int_to_ptr.hbm [resolvable:$true] %s188_s9 }
  0x14   : > { %s190_s8 = sshll.u32 %s178_s7, 4  ;;  %p599_p0 = pnand %p606_p13, %p854_p4  ;;  %s191_s8 = int_to_ptr.vmem [resolvable:$true] %s190_s8 }
  0x15   : > { %p568_p1 = scmp.ge.s32.totalorder %s787_s17, 1  ;;  %s175_s10 = scalar_lea.sflag [#allocation3], %s174_s28 }
  0x16   : > { %s789_s11 = smov 128   ;;  %s790_s18 = smov 8  }
  0x17   : > { %601 = dma.hbm_to_vmem [thread:$0]  (!%p599_p0), %s189_s9, 1024, %s191_s8, %s175_s10, %s789_s11, %s789_s11, %s790_s18  }
  0x18   : > { %p198_p2 = scmp.lt.s32.totalorder %s787_s17, 3 }
  0x1a   : > { %p199_p3 = pnand %p568_p1, %p198_p2 }
  0x1b   : > { %s887_s19 = sand.u32 (!%p199_p3), 1, %s771_s13  }
  0x1c   : > { %202 = sbr.rel (%p199_p3) target bundleno = 430 (0x1ae), region = 32  ;;  %s569_s21 = sshll.u32 (!%p199_p3), %s887_s19, 6 }
  0x1d   : > { %s205_s23 = scalar_lea.sflag (!%p199_p3), [#allocation3], %s887_s19  ;;  %s891_s29 = scalar_lea.vmem (!%p199_p3), [#allocation2], %s569_s21 }
  0x21   : > { %758 = dma.done.wait (%p860_p8), %s205_s23, 1024  }
  0x22   : > { %760 = vsyncadd (%p860_p8), %s205_s23, 4294966272  ;;  %p237_p4 = scmp.lt.s32.totalorder %s779_s15, 1  ;;  %v258_v12 = vld [vmem:[%s959_s0] sm:$0xff]  ;;  %v259_v14 = vld [vmem:[%s959_s0 + $0x8] sm:$0xff]  ;;  %vm262_vm0 = vcmask 31744   ;;  %vm337_vm5 = vcmask 130048  }
  0x23   : > { %v304_v40 = vld [vmem:[%s891_s29 + $0x8] sm:$0xff]  ;;  %v575_v41 = vld [vmem:[%s891_s29 + $0x18] sm:$0xff]  ;;  %v303_v45 = vld [vmem:[%s891_s29] sm:$0xff]  ;;  %s570_s9 = sshll.u32 %s887_s19, 4  ;;  %s593_s10 = sshll.u32 %s779_s15, 4  ;;  %vm361_vm6 = vcmask 519168  }
  0x24   : > { %s238_s22 = scalar_select %p237_p4, %s779_s15, 1  ;;  %v579_v42 = vld [vmem:[%s891_s29 + $0x28] sm:$0xff]  ;;  %355 = vmatpush.msra.mxu0 %v304_v40  ;;  %380 = vmatpush.msra.mxu1 %v575_v41  ;;  %v583_v44 = vld [vmem:[%s891_s29 + $0x38] sm:$0xff]  ;;  %v574_v46 = vld [vmem:[%s891_s29 + $0x10] sm:$0xff] }
  0x25   : > { %405 = vmatpush.msra.mxu2 %v579_v42  ;;  %430 = vmatpush.msra.mxu3 %v583_v44  ;;  %v578_v47 = vld [vmem:[%s891_s29 + $0x20] sm:$0xff]  ;;  %v582_v48 = vld [vmem:[%s891_s29 + $0x30] sm:$0xff]  ;;  %s453_s21 = scalar_lea.hbm %s962_s3, %s593_s10  ;;  %s236_s23 = scalar_lea.vmem [#allocation5], %s570_s9 }
  0x26   : > { %s592_s28 = sshll.u32 %s238_s22, 4  ;;  %356 = vmatpush.msra.mxu0 %v303_v45  ;;  %381 = vmatpush.msra.mxu1 %v574_v46  ;;  %s454_s29 = sshll.u32 %s236_s23, 4  ;;  %s455_s29 = int_to_ptr.vmem [resolvable:$true] %s454_s29 }
  0x27   : > { %s241_s5 = scalar_lea.vmem %s960_s1, %s592_s28  ;;  %406 = vmatpush.msra.mxu2 %v578_v47  ;;  %431 = vmatpush.msra.mxu3 %v582_v48  ;;  %s456_s22 = sshll.u32 %s453_s21, 4  ;;  %s457_s22 = int_to_ptr.hbm [resolvable:$true] %s456_s22 }
  0x28   : > { %v244_v0 = vld [vmem:[%s241_s5] sm:$0xff]  ;;  %v245_v1 = vld [vmem:[%s241_s5 + $0x8] sm:$0xff]  ;;  %s439_s15 = scalar_lea.sflag [#allocation4], %s887_s19  ;;  %s719_s28 = sshra.s32 %s457_s22, 4  ;;  %s720_s28 = int_to_ptr.hbm [resolvable:$true] %s719_s28 }
  0x29   : > { %661 = vlog2.f32 %v244_v0  ;;  %s721_s30 = scalar_lea.hbm %s720_s28, 16  ;;  %s725_s24 = scalar_lea.hbm %s962_s3, 32 }
  0x2a   : > { %663 = vlog2.f32 %v245_v1  ;;  %p722_p5 = scmp.ne.s32.totalorder %s720_s28, %s721_s30  ;;  %p726_p8 = scmp.lt.s32.totalorder %s720_s28, %s962_s3 }
  0x2b   : > { %p727_p10 = scmp.lt.s32.totalorder %s725_s24, %s721_s30 }
  0x2c   : > { %p723_p6 = pnand %p722_p5, %p864_p9 }
  0x2d   : > { %p728_p13 = por %p727_p10, %p726_p8 }
  0x2e   : > { %p724_p7 = pneg %p723_p6 }
  0x2f   : > { %v662_v2 = vpop.eup %661 }
  0x30   : > { %v664_v3 = vpop.eup %663  ;;  %v247_v4 = vmul.f32 0.6931472, %v662_v2  ;;  %p729_p0 = pnand %p728_p13, %p724_p7 }
  0x31   : > { %v249_v5 = vmul.f32 0.6931472, %v664_v3 }
  0x32   : > { %v250_v6 = vsub.f32 0.0, %v247_v4 }
  0x33   : > { %v251_v7 = vsub.f32 0.0, %v249_v5 }
  0x34   : > { %665 = vlog2.f32 %v250_v6 }
  0x35   : > { %667 = vlog2.f32 %v251_v7 }
  0x3a   : > { %v666_v8 = vpop.eup %665 }
  0x3b   : > { %v668_v9 = vpop.eup %667  ;;  %v253_v10 = vmul.f32 0.6931472, %v666_v8 }
  0x3c   : > { %v255_v11 = vmul.f32 0.6931472, %v668_v9 }
  0x3d   : > { %v256_v13 = vsub.f32 0.0, %v253_v10 }
  0x3e   : > { %v257_v15 = vsub.f32 0.0, %v255_v11 }
  0x3f   : > { %v260_v16 = vadd.f32 %v258_v12, %v256_v13 }
  0x40   : > { %v261_v17 = vadd.f32 %v259_v14, %v257_v15 }
  0x41   : > { %v263_v18 = vsel %vm262_vm0, %v260_v16, -inf }
  0x42   : > { %v264_v19 = vsel %vm262_vm0, %v261_v17, -inf }
  0x43   : > { %v265_v20 = vmax.f32 %v263_v18, %v264_v19 }
  0x45   : > { %v266_v21 = vrot.slane %v265_v20, 4 }
  0x47   : > { %v267_v22 = vmax.f32 %v265_v20, %v266_v21 }
  0x49   : > { %v268_v23 = vrot.slane %v267_v22, 2 }
  0x4b   : > { %v269_v24 = vmax.f32 %v267_v22, %v268_v23 }
  0x4d   : > { %v270_v25 = vrot.slane %v269_v24, 1 }
  0x4f   : > { %v271_v26 = vmax.f32 %v269_v24, %v270_v25 }
  0x51   : > { %v272_v27 = vsub.f32 %v260_v16, %v271_v26  ;;  %v273_v28 = vsub.f32 %v261_v17, %v271_v26 }
  0x53   : > { %v274_v29 = vmul.f32 1.442695, %v272_v27  ;;  %v276_v30 = vmul.f32 1.442695, %v273_v28 }
  0x55   : > { %669 = vpow2.f32 %v274_v29 }
  0x56   : > { %671 = vpow2.f32 %v276_v30 }
  0x5b   : > { %v670_v31 = vpop.eup %669 }
  0x5c   : > { %v672_v32 = vpop.eup %671  ;;  %v278_v33 = vsel %vm262_vm0, %v670_v31, 0.0 }
  0x5d   : > { %v279_v34 = vsel %vm262_vm0, %v672_v32, 0.0 }
  0x5e   : > { %v280_v35 = vadd.f32 %v279_v34, %v278_v33 }
  0x60   : > { %v281_v36 = vrot.slane %v280_v35, 4 }
  0x62   : > { %v282_v37 = vadd.f32 %v281_v36, %v280_v35 }
  0x64   : > { %v283_v38 = vrot.slane %v282_v37, 2 }
  0x66   : > { %v284_v39 = vadd.f32 %v283_v38, %v282_v37 }
  0x68   : > { %v285_v43 = vrot.slane %v284_v39, 1 }
  0x6a   : > { %v286_v49 = vadd.f32 %v285_v43, %v284_v39 }
  0x6c   : > { %673 = vrcp.f32 %v286_v49  ;;  %v298_v52 = vand.u32 2147483648, %v286_v49  ;;  %vm292_vm1 = vweird.f32 %v286_v49  ;;  %v296_v54 = vand.u32 2147483647, %v286_v49 }
  0x6e   : > { %v299_v56 = vor.u32 1.1754944e-38, %v298_v52  ;;  %vm297_vm4 = vcmp.eq.f32.partialorder %v296_v54, 8.507059e+37 }
  0x72   : > { %v674_v50 = vpop.eup %673 }
  0x73   : > { %v288_v51 = vmul.f32 %v674_v50, %v286_v49  ;;  %vm293_vm2 = vweird.f32 %v674_v50 }
  0x74   : > { %vm294_vm3 = vmor %vm292_vm1, %vm293_vm2 }
  0x75   : > { %v289_v53 = vsub.f32 1.0, %v288_v51 }
  0x77   : > { %v290_v55 = vmul.f32 %v674_v50, %v289_v53 }
  0x79   : > { %v291_v57 = vadd.f32 %v674_v50, %v290_v55 }
  0x7b   : > { %v295_v58 = vsel %vm294_vm3, %v674_v50, %v291_v57 }
  0x7c   : > { %v300_v59 = vsel %vm297_vm4, %v299_v56, %v295_v58 }
  0x7d   : > { %v301_v60 = vmul.f32 %v670_v31, %v300_v59  ;;  %v302_v61 = vmul.f32 %v672_v32, %v300_v59 }
  0x7f   : > { %305 = vxpose.xlu0.b32.start [1/2] (short) (narrow) %v301_v60, 8 }
  0x87   : > { %306 = vxpose.xlu0.b32.end [2/2] (short) (narrow) %v302_v61, 8 }
 0x123   : > { %v321_v62 = vpop.trf.xlu0 }
 0x124   : > { %573 = vmatmul.msk.f32.vlgmr.msra.gmra.mxu0 %vm337_vm5, %v321_v62  ;;  %576 = vmatmul.msk.f32.vlgmr.msra.gmra.mxu1 %vm337_vm5, %v321_v62 }
 0x125   : > { %580 = vmatmul.msk.f32.vlgmr.msra.gmra.mxu2 %vm337_vm5, %v321_v62  ;;  %584 = vmatmul.msk.f32.vlgmr.msra.gmra.mxu3 %vm337_vm5, %v321_v62 }
 0x1a1   : > { %v358_v63 = vpop.f32.mrf.mxu0  ;;  %v383_v0 = vpop.f32.mrf.mxu1 }
 0x1a2   : > { %362 = vst.msk [vmem:[%s236_s23] sm:$0xf] %vm361_vm6, %v358_v63 }
 0x1a3   : > { %577 = vst.msk [vmem:[%s236_s23 + $0x4] sm:$0xf] %vm361_vm6, %v383_v0 }
 0x1a8   : > { %v408_v1 = vpop.f32.mrf.mxu2  ;;  %v433_v2 = vpop.f32.mrf.mxu3 }
 0x1a9   : > { %581 = vst.msk [vmem:[%s236_s23 + $0x8] sm:$0xf] %vm361_vm6, %v408_v1 }
 0x1aa   : > { %585 = vst.msk [vmem:[%s236_s23 + $0xc] sm:$0xf] %vm361_vm6, %v433_v2 }
 0x1ab   : > { %732 = shalt.err (!%p729_p0)
}
 0x1ac   : > { %s791_s19 = smov 64   ;;  %s792_s8 = smov 4  }
 0x1ad   : > { %596 = dma.vmem_to_hbm [thread:$0]  (%p864_p9), %s455_s29, 256, %s457_s22, %s439_s15, %s791_s19, %s791_s19, %s792_s8  }
 0x1ae PF: > { %s471_s9 = sand.u32 1, %s767_s12   ;;  %p603_p1 = pnand %p564_p12, %p871_p11 }
 0x1af   : > { %s472_s10 = scalar_lea.sflag [#allocation4], %s471_s9 }
 0x1b0   : > { %p604_p2 = pneg %p603_p1 }
 0x1b2   : > { %762 = dma.done.wait (%p604_p2), %s472_s10, 256  }
 0x1b3   : > { %764 = vsyncadd (%p604_p2), %s472_s10, 4294967040  ;;  %s19_s17 = sadd.s32 1, %s787_s17   ;;  %s967_s12 = smov %s771_s13 }
 0x1b4   : > { %p16_p3 = scmp.ge.s32.totalorder %s19_s17, 4   ;;  %s968_s13 = smov %s775_s14 }
 0x1b5   : > { %s969_s14 = smov %s869_s26  ;;  %s970_s15 = smov %s783_s16 }
 0x1b6   : > { %s971_s16 = smov %s973_s20  ;;  %18 = sbr.rel (!%p16_p3) target bundleno = 6 (0x6), region = 86 }
 0x1bb   :  { %478 = vsyncpa [#allocation3], 1 }
 0x1bc   :  { %480 = vsyncpa [#allocation3 + $0x1], 1 }
 0x1bd   :  { %481 = vsyncpa [#allocation4], 1 }
 0x1be   :  { %483 = vsyncpa [#allocation4 + $0x1], 1 }

</bundles_post_ra>
